<compile_context>
chip_gen: v5e
topology: v5e:2x2
jax: 0.10.0
libtpu: 0.0.40
codegen_flags: <defaults>
</compile_context>

<pallas_src>
import functools

import jax
import jax.numpy as jnp
from jax.experimental import pallas as pl
from jax.experimental.pallas import tpu as pltpu

BETA = 1.0          # beta_shift in MAG
NORM_EPS = 1e-6     # eps added to ||H||
LN_EPS = 1e-12      # BertLayerNorm eps


def _round_up(x, m):
    return ((x + m - 1) // m) * m


def mag_fused_kernel(x_ref, w_ref, b_ref, lng_ref, lnb_ref, o_ref, *,
                     d_real, d_pad):
    """One grid step = one tile of fused rows.

    x_ref : (T, K)  with K = d_pad + Dv + Da; lanes [0:d_pad] hold h (zero-padded)
    w_ref : (K, 4*d_pad)  column blocks [gate_v | gate_a | vis | aco]
    b_ref : (1, 4*d_pad)  fused biases
    """
    x_in = x_ref[...]
    # Read each small resident ref exactly once and reuse.
    w = w_ref[...]
    bias = b_ref[...].astype(jnp.float32)
    ln_g = lng_ref[...].astype(jnp.float32)
    ln_b = lnb_ref[...].astype(jnp.float32)

    # Single lane-dense GEMM replacing the six tiny (K<=32, N=32) matmuls.
    pre = jnp.dot(x_in, w, preferred_element_type=jnp.float32) + bias

    gate_v = jnp.maximum(pre[:, 0 * d_pad:1 * d_pad], 0.0)
    gate_a = jnp.maximum(pre[:, 1 * d_pad:2 * d_pad], 0.0)
    vis = pre[:, 2 * d_pad:3 * d_pad]
    aco = pre[:, 3 * d_pad:4 * d_pad]

    h = x_in[:, :d_pad].astype(jnp.float32)   # padded lanes are exactly 0
    h_m = gate_v * vis + gate_a * aco          # padded lanes are exactly 0

    # Adaptation gate scaling: sqrt / reciprocal go to the EUP slot.
    em_norm = jnp.sqrt(jnp.sum(h * h, axis=-1, keepdims=True))
    hm_norm = jnp.sqrt(jnp.sum(h_m * h_m, axis=-1, keepdims=True))
    alpha = jnp.minimum(
        em_norm * pl.reciprocal(hm_norm + NORM_EPS, approx=True) * BETA, 1.0)

    xr = h + alpha * h_m

    # LayerNorm over the d_real true features.  Padded lanes of xr are exactly
    # zero, so sum(xr) already equals the real-lane sum; each padded lane adds
    # exactly mean^2 to sum((x-mean)^2), which is subtracted back, so the
    # result matches the unpadded two-pass formula.
    inv_d = 1.0 / d_real
    mean = jnp.sum(xr, axis=-1, keepdims=True) * inv_d
    xc = xr - mean
    n_pad = d_pad - d_real
    var = (jnp.sum(xc * xc, axis=-1, keepdims=True) - n_pad * mean * mean) * inv_d
    y = xc * jax.lax.rsqrt(var + LN_EPS)
    # Padded output lanes end up as ln_b_pad == 0; wrapper slices them off.
    o_ref[...] = (y * ln_g + ln_b).astype(o_ref.dtype)


@functools.partial(jax.jit, static_argnames=("tile_rows",))
def mia_forward(text_feats, video_data, audio_data, params, tile_rows=256):
    B, S, Dt = text_feats.shape
    Dv = video_data.shape[-1]
    Da = audio_data.shape[-1]
    N = B * S

    # Lane-dense padded hidden width (multiple of 128).
    Dt_p = _round_up(Dt, 128)
    # Row tile: big by default, but keep >=2 grid blocks so both v7x
    # TensorCores get work; always a multiple of 8 sublanes.
    tr = max(8, min(tile_rows, _round_up(max(pl.cdiv(N, 2), 8), 8)))
    N_pad = _round_up(N, tr)
    K = Dt_p + Dv + Da

    f32 = jnp.float32
    p = {k: v.astype(f32) for k, v in params.items()}

    # ---- fuse the six projection matrices into one (K, 4*Dt_p) block matrix.
    #      column blocks: [gate_v | gate_a | vis | aco]
    #      row blocks   : h (first Dt_p rows), v (Dv rows), a (Da rows)
    def pad_cols(wm):
        return jnp.pad(wm, ((0, 0), (0, Dt_p - Dt)))

    zh = jnp.zeros((Dt, Dt_p), f32)
    zv = jnp.zeros((Dv, Dt_p), f32)
    za = jnp.zeros((Da, Dt_p), f32)
    w_h = jnp.concatenate(
        [pad_cols(p["whv_h"]), pad_cols(p["wha_h"]), zh, zh], axis=1)
    w_h = jnp.pad(w_h, ((0, Dt_p - Dt), (0, 0)))
    w_v = jnp.concatenate(
        [pad_cols(p["whv_v"]), zv, pad_cols(p["wv"]), zv], axis=1)
    w_a = jnp.concatenate(
        [za, pad_cols(p["wha_a"]), za, pad_cols(p["wa"])], axis=1)
    w_fused = jnp.concatenate([w_h, w_v, w_a], axis=0)            # (K, 4*Dt_p)
    b_fused = jnp.concatenate(
        [pad_cols(p["bhv"]), pad_cols(p["bha"]),
         pad_cols(p["bv"]), pad_cols(p["ba"])], axis=1)           # (1, 4*Dt_p)
    ln_g = pad_cols(p["ln_g"])
    ln_b = pad_cols(p["ln_b"])

    # ---- pack activations: X = [h (padded to Dt_p) | v | a], rows -> N_pad.
    # (For bandwidth-bound production shapes, cast x / output to bf16 here;
    #  the kernel accumulates and normalizes in f32 either way.)
    h = text_feats.reshape(N, Dt)
    v = video_data.reshape(N, Dv)
    a = audio_data.reshape(N, Da)
    h = jnp.pad(h, ((0, N_pad - N), (0, Dt_p - Dt)))
    v = jnp.pad(v, ((0, N_pad - N), (0, 0)))
    a = jnp.pad(a, ((0, N_pad - N), (0, 0)))
    x = jnp.concatenate([h, v, a], axis=-1)                       # (N_pad, K)

    itemsize = jnp.dtype(text_feats.dtype).itemsize
    cost = pl.CostEstimate(
        flops=int(2 * N_pad * K * 4 * Dt_p + 16 * N_pad * Dt_p),
        transcendentals=int(4 * N_pad),
        bytes_accessed=int(N_pad * (K + Dt_p) * itemsize
                           + (K * 4 * Dt_p + 6 * Dt_p) * 4),
    )

    row_spec = pl.BlockSpec((tr, K), lambda i: (i, 0))
    out_spec = pl.BlockSpec((tr, Dt_p), lambda i: (i, 0))
    const = lambda r, c: pl.BlockSpec((r, c), lambda i: (0, 0))   # resident

    out = pl.pallas_call(
        functools.partial(mag_fused_kernel, d_real=Dt, d_pad=Dt_p),
        out_shape=jax.ShapeDtypeStruct((N_pad, Dt_p), text_feats.dtype),
        grid_spec=pltpu.PrefetchScalarGridSpec(
            num_scalar_prefetch=0,
            grid=(N_pad // tr,),
            in_specs=[
                row_spec,                 # X
                const(K, 4 * Dt_p),       # W_fused
                const(1, 4 * Dt_p),       # b_fused
                const(1, Dt_p),           # ln_gamma
                const(1, Dt_p),           # ln_beta
            ],
            out_specs=out_spec,
        ),
        compiler_params=pltpu.CompilerParams(
            dimension_semantics=("parallel",)),
        cost_estimate=cost,
    )(x, w_fused, b_fused, ln_g, ln_b)

    return out[:N, :Dt].reshape(B, S, Dt)


def make_params(key, Dt, Dv, Da):
    ks = jax.random.split(key, 6)
    scale = 0.02
    return {
        "whv_h": scale * jax.random.normal(ks[0], (Dt, Dt), jnp.float32),
        "whv_v": scale * jax.random.normal(ks[1], (Dv, Dt), jnp.float32),
        "bhv":   jnp.zeros((1, Dt), jnp.float32),
        "wha_h": scale * jax.random.normal(ks[2], (Dt, Dt), jnp.float32),
        "wha_a": scale * jax.random.normal(ks[3], (Da, Dt), jnp.float32),
        "bha":   jnp.zeros((1, Dt), jnp.float32),
        "wv":    scale * jax.random.normal(ks[4], (Dv, Dt), jnp.float32),
        "bv":    jnp.zeros((1, Dt), jnp.float32),
        "wa":    scale * jax.random.normal(ks[5], (Da, Dt), jnp.float32),
        "ba":    jnp.zeros((1, Dt), jnp.float32),
        "ln_g":  jnp.ones((1, Dt), jnp.float32),
        "ln_b":  jnp.zeros((1, Dt), jnp.float32),
    }


def mia_reference(text_feats, video_data, audio_data, p):
    h, v, a = (x.astype(jnp.float32) for x in (text_feats, video_data, audio_data))
    gate_v = jax.nn.relu(h @ p["whv_h"] + v @ p["whv_v"] + p["bhv"])
    gate_a = jax.nn.relu(h @ p["wha_h"] + a @ p["wha_a"] + p["bha"])
    h_m = gate_v * (v @ p["wv"] + p["bv"]) + gate_a * (a @ p["wa"] + p["ba"])
    em = jnp.linalg.norm(h, axis=-1, keepdims=True)
    hm = jnp.linalg.norm(h_m, axis=-1, keepdims=True)
    alpha = jnp.minimum(em / (hm + NORM_EPS) * BETA, 1.0)
    x = h + alpha * h_m
    mean = x.mean(-1, keepdims=True)
    var = ((x - mean) ** 2).mean(-1, keepdims=True)
    return (x - mean) * jax.lax.rsqrt(var + LN_EPS) * p["ln_g"] + p["ln_b"]


if __name__ == "__main__":
    key = jax.random.PRNGKey(0)
    k_t, k_v, k_a, k_p = jax.random.split(key, 4)

    B, S = 2, 8
    D_text, D_video, D_audio = 32, 16, 16

    text_feats = jax.random.normal(k_t, (B, S, D_text), jnp.float32)
    video_data = jax.random.normal(k_v, (B, S, D_video), jnp.float32)
    audio_data = jax.random.normal(k_a, (B, S, D_audio), jnp.float32)
    params = make_params(k_p, D_text, D_video, D_audio)

    out = mia_forward(text_feats, video_data, audio_data, params)
    out = jax.block_until_ready(out)

    ref = mia_reference(text_feats, video_data, audio_data, params)
    assert out.shape == (B, S, D_text)
    # Slightly relaxed tolerance: alpha uses the EUP approx reciprocal.
    assert jnp.allclose(out, ref, atol=2e-4, rtol=2e-4), "mismatch vs reference"

    print("KERNEL_OK")
</pallas_src>

<mosaic_0001>
module attributes {stable_mosaic.version = 11 : i64} {
  func.func @mag_fused_kernel(%arg0: i32, %arg1: memref<8x160xf32, #tpu.memory_space<vmem>>, %arg2: memref<160x512xf32, #tpu.memory_space<vmem>>, %arg3: memref<1x512xf32, #tpu.memory_space<vmem>>, %arg4: memref<1x128xf32, #tpu.memory_space<vmem>>, %arg5: memref<1x128xf32, #tpu.memory_space<vmem>>, %arg6: memref<8x128xf32, #tpu.memory_space<vmem>>) attributes {dimension_semantics = [#tpu.dimension_semantics<parallel>], iteration_bounds = array<i64: 2>, scalar_prefetch = 0 : i64, scratch_operands = 0 : i64, tpu.core_type = #tpu.core_type<tc>, window_params = [{transform_indices = @transform_0, window_bounds = array<i64: 8, 160>}, {pipeline_mode = #tpu.pipeline_mode<synchronous>, transform_indices = @transform_1, window_bounds = array<i64: 160, 512>}, {pipeline_mode = #tpu.pipeline_mode<synchronous>, transform_indices = @transform_2, window_bounds = array<i64: 1, 512>}, {pipeline_mode = #tpu.pipeline_mode<synchronous>, transform_indices = @transform_3, window_bounds = array<i64: 1, 128>}, {pipeline_mode = #tpu.pipeline_mode<synchronous>, transform_indices = @transform_4, window_bounds = array<i64: 1, 128>}, {transform_indices = @transform_5, window_bounds = array<i64: 8, 128>}]} {
    %c0 = arith.constant 0 : index
    %c0_0 = arith.constant 0 : index
    %0 = vector.load %arg1[%c0, %c0_0] : memref<8x160xf32, #tpu.memory_space<vmem>>, vector<8x160xf32>
    %c0_1 = arith.constant 0 : index
    %c0_2 = arith.constant 0 : index
    %1 = vector.load %arg2[%c0_1, %c0_2] : memref<160x512xf32, #tpu.memory_space<vmem>>, vector<160x512xf32>
    %c0_3 = arith.constant 0 : index
    %c0_4 = arith.constant 0 : index
    %2 = vector.load %arg3[%c0_3, %c0_4] : memref<1x512xf32, #tpu.memory_space<vmem>>, vector<1x512xf32>
    %c0_5 = arith.constant 0 : index
    %c0_6 = arith.constant 0 : index
    %3 = vector.load %arg4[%c0_5, %c0_6] : memref<1x128xf32, #tpu.memory_space<vmem>>, vector<1x128xf32>
    %c0_7 = arith.constant 0 : index
    %c0_8 = arith.constant 0 : index
    %4 = vector.load %arg5[%c0_7, %c0_8] : memref<1x128xf32, #tpu.memory_space<vmem>>, vector<1x128xf32>
    %cst = arith.constant dense<0.000000e+00> : vector<8x512xf32>
    %5 = tpu.matmul %0, %1, %cst {dimension_numbers = #tpu.dot_dimension_numbers<[1], [0], [0], [1], [0, 0, 1, 1], [], []>} : vector<8x160xf32>, vector<160x512xf32>, vector<8x512xf32> -> vector<8x512xf32>
    %6 = vector.broadcast %2 : vector<1x512xf32> to vector<8x512xf32>
    %7 = arith.addf %5, %6 : vector<8x512xf32>
    %8 = vector.extract_strided_slice %7 {offsets = [0, 0], sizes = [8, 128], strides = [1, 1]} : vector<8x512xf32> to vector<8x128xf32>
    %cst_9 = arith.constant 0.000000e+00 : f32
    %9 = vector.broadcast %cst_9 : f32 to vector<8x128xf32>
    %10 = arith.maximumf %8, %9 : vector<8x128xf32>
    %11 = vector.extract_strided_slice %7 {offsets = [0, 128], sizes = [8, 128], strides = [1, 1]} : vector<8x512xf32> to vector<8x128xf32>
    %cst_10 = arith.constant 0.000000e+00 : f32
    %12 = vector.broadcast %cst_10 : f32 to vector<8x128xf32>
    %13 = arith.maximumf %11, %12 : vector<8x128xf32>
    %14 = vector.extract_strided_slice %7 {offsets = [0, 256], sizes = [8, 128], strides = [1, 1]} : vector<8x512xf32> to vector<8x128xf32>
    %15 = vector.extract_strided_slice %7 {offsets = [0, 384], sizes = [8, 128], strides = [1, 1]} : vector<8x512xf32> to vector<8x128xf32>
    %16 = vector.extract_strided_slice %0 {offsets = [0, 0], sizes = [8, 128], strides = [1, 1]} : vector<8x160xf32> to vector<8x128xf32>
    %17 = arith.mulf %10, %14 : vector<8x128xf32>
    %18 = arith.mulf %13, %15 : vector<8x128xf32>
    %19 = arith.addf %17, %18 : vector<8x128xf32>
    %20 = arith.mulf %16, %16 : vector<8x128xf32>
    %cst_11 = arith.constant dense<0.000000e+00> : vector<8xf32>
    %21 = vector.multi_reduction <add>, %20, %cst_11 [1] : vector<8x128xf32> to vector<8xf32>
    %22 = vector.shape_cast %21 : vector<8xf32> to vector<8x1xf32>
    %23 = math.sqrt %22 : vector<8x1xf32>
    %24 = arith.mulf %19, %19 : vector<8x128xf32>
    %cst_12 = arith.constant dense<0.000000e+00> : vector<8xf32>
    %25 = vector.multi_reduction <add>, %24, %cst_12 [1] : vector<8x128xf32> to vector<8xf32>
    %26 = vector.shape_cast %25 : vector<8xf32> to vector<8x1xf32>
    %27 = math.sqrt %26 : vector<8x1xf32>
    %cst_13 = arith.constant 9.99999997E-7 : f32
    %28 = vector.broadcast %cst_13 : f32 to vector<8x1xf32>
    %29 = arith.addf %27, %28 : vector<8x1xf32>
    %30 = tpu.reciprocal %29 {approx = true} : vector<8x1xf32> -> vector<8x1xf32>
    %31 = arith.mulf %23, %30 : vector<8x1xf32>
    %cst_14 = arith.constant 1.000000e+00 : f32
    %32 = vector.broadcast %cst_14 : f32 to vector<8x1xf32>
    %33 = arith.mulf %31, %32 : vector<8x1xf32>
    %cst_15 = arith.constant 1.000000e+00 : f32
    %34 = vector.broadcast %cst_15 : f32 to vector<8x1xf32>
    %35 = arith.minimumf %33, %34 : vector<8x1xf32>
    %36 = vector.broadcast %35 : vector<8x1xf32> to vector<8x128xf32>
    %37 = arith.mulf %36, %19 : vector<8x128xf32>
    %38 = arith.addf %16, %37 : vector<8x128xf32>
    %cst_16 = arith.constant dense<0.000000e+00> : vector<8xf32>
    %39 = vector.multi_reduction <add>, %38, %cst_16 [1] : vector<8x128xf32> to vector<8xf32>
    %40 = vector.shape_cast %39 : vector<8xf32> to vector<8x1xf32>
    %cst_17 = arith.constant 3.125000e-02 : f32
    %41 = vector.broadcast %cst_17 : f32 to vector<8x1xf32>
    %42 = arith.mulf %40, %41 : vector<8x1xf32>
    %43 = vector.broadcast %42 : vector<8x1xf32> to vector<8x128xf32>
    %44 = arith.subf %38, %43 : vector<8x128xf32>
    %45 = arith.mulf %44, %44 : vector<8x128xf32>
    %cst_18 = arith.constant dense<0.000000e+00> : vector<8xf32>
    %46 = vector.multi_reduction <add>, %45, %cst_18 [1] : vector<8x128xf32> to vector<8xf32>
    %47 = vector.shape_cast %46 : vector<8xf32> to vector<8x1xf32>
    %cst_19 = arith.constant 9.600000e+01 : f32
    %48 = vector.broadcast %cst_19 : f32 to vector<8x1xf32>
    %49 = arith.mulf %48, %42 : vector<8x1xf32>
    %50 = arith.mulf %49, %42 : vector<8x1xf32>
    %51 = arith.subf %47, %50 : vector<8x1xf32>
    %cst_20 = arith.constant 3.125000e-02 : f32
    %52 = vector.broadcast %cst_20 : f32 to vector<8x1xf32>
    %53 = arith.mulf %51, %52 : vector<8x1xf32>
    %cst_21 = arith.constant 9.99999996E-13 : f32
    %54 = vector.broadcast %cst_21 : f32 to vector<8x1xf32>
    %55 = arith.addf %53, %54 : vector<8x1xf32>
    %56 = math.rsqrt %55 : vector<8x1xf32>
    %57 = vector.broadcast %56 : vector<8x1xf32> to vector<8x128xf32>
    %58 = arith.mulf %44, %57 : vector<8x128xf32>
    %59 = vector.broadcast %3 : vector<1x128xf32> to vector<8x128xf32>
    %60 = arith.mulf %58, %59 : vector<8x128xf32>
    %61 = vector.broadcast %4 : vector<1x128xf32> to vector<8x128xf32>
    %62 = arith.addf %60, %61 : vector<8x128xf32>
    %c0_22 = arith.constant 0 : index
    %c0_23 = arith.constant 0 : index
    %63 = vector.load %arg6[%c0_22, %c0_23] : memref<8x128xf32, #tpu.memory_space<vmem>>, vector<8x128xf32>
    tpu.vector_store %arg6[%c0_22, %c0_23], %62 {strides = array<i32>} : memref<8x128xf32, #tpu.memory_space<vmem>>, vector<8x128xf32>,
    return
  }
  func.func @transform_0(%arg0: i32) -> (i32, i32) {
    %c0_i32 = arith.constant 0 : i32
    %c0_i32_0 = arith.constant 0 : i32
    return %arg0, %c0_i32 : i32, i32
  }
  func.func @transform_1(%arg0: i32) -> (i32, i32) {
    %c0_i32 = arith.constant 0 : i32
    %c0_i32_0 = arith.constant 0 : i32
    %c0_i32_1 = arith.constant 0 : i32
    return %c0_i32, %c0_i32_0 : i32, i32
  }
  func.func @transform_2(%arg0: i32) -> (i32, i32) {
    %c0_i32 = arith.constant 0 : i32
    %c0_i32_0 = arith.constant 0 : i32
    %c0_i32_1 = arith.constant 0 : i32
    return %c0_i32, %c0_i32_0 : i32, i32
  }
  func.func @transform_3(%arg0: i32) -> (i32, i32) {
    %c0_i32 = arith.constant 0 : i32
    %c0_i32_0 = arith.constant 0 : i32
    %c0_i32_1 = arith.constant 0 : i32
    return %c0_i32, %c0_i32_0 : i32, i32
  }
  func.func @transform_4(%arg0: i32) -> (i32, i32) {
    %c0_i32 = arith.constant 0 : i32
    %c0_i32_0 = arith.constant 0 : i32
    %c0_i32_1 = arith.constant 0 : i32
    return %c0_i32, %c0_i32_0 : i32, i32
  }
  func.func @transform_5(%arg0: i32) -> (i32, i32) {
    %c0_i32 = arith.constant 0 : i32
    %c0_i32_0 = arith.constant 0 : i32
    return %arg0, %c0_i32 : i32, i32
  }
}

</mosaic_0001>

<bundles_post_ra>
// kernel: mia_forward.1
= control target key start
LH: loop header
LB: loop body
LE: loop exit
PB: predicated region body
PF: predicated region fallthrough
CT: control target
= control target key end

     0   :  { %s678_s18 = smov 0   ;;  %s971_s0 = inlined_call_operand.vmem [shape: f32[16,160], index: 0, kind: input, shape index: {}]   ;;  %s972_s1 = inlined_call_operand.vmem [shape: f32[160,512], index: 1, kind: input, shape index: {}]   ;;  %s973_s2 = inlined_call_operand.vmem [shape: f32[1,512], index: 2, kind: input, shape index: {}]   ;;  %s974_s3 = inlined_call_operand.vmem [shape: f32[1,128], index: 3, kind: input, shape index: {}]   ;;  %s975_s4 = inlined_call_operand.vmem [shape: f32[1,128], index: 4, kind: input, shape index: {}]   ;;  %s976_s5 = inlined_call_operand.vmem [shape: f32[16,128], index: 5, kind: output, shape index: {}]  }
   0x1 LB: > { %s607_s19 = sadd.s32 4294967295, %s646_s18   ;;  %p611_p0 = scmp.ge.s32.totalorder %s646_s18, 1  ;;  %s646_s18 = sphi %s678_s18, %s15_s18  }
   0x2   : > { %p187_p1 = scmp.lt.s32.totalorder %s646_s18, 3 }
   0x4   : > { %p188_p2 = pnand %p611_p0, %p187_p1 }
   0x5   : > { %p787_p3 = scmp.lt.s32.totalorder (!%p188_p2), %s607_s19, 1 }
   0x6   : > { %191 = sbr.rel (%p188_p2) target bundleno = 619 (0x26b), region = 40 }
   0xb   : > { %v301_v0 = vld [vmem:[%s972_s1 + $0x260] sm:$0xff]  ;;  %v286_v1 = vld [vmem:[%s972_s1 + $0x1e8] sm:$0xff]  ;;  %v303_v2 = vld [vmem:[%s972_s1 + $0x270] sm:$0xff]  ;;  %s979_s19 = smov (!%p787_p3, %s607_s19), 1  ;;  %vm317_vm0 = vcmask 261120  }
   0xc   : > { %353 = vmatpush.msra.mxu1 %v301_v0  ;;  %361 = vmatpush.msra.mxu2 %v286_v1  ;;  %v297_v3 = vld [vmem:[%s972_s1 + $0x240] sm:$0xff]  ;;  %v282_v4 = vld [vmem:[%s972_s1 + $0x1c8] sm:$0xff]  ;;  %v299_v5 = vld [vmem:[%s972_s1 + $0x250] sm:$0xff]  ;;  %s621_s27 = sshll.u32 %s979_s19, 4 }
   0xd   : > { %433 = vmatpush.msra.mxu3 %v303_v2  ;;  %v285_v6 = vld [vmem:[%s972_s1 + $0x1e0] sm:$0xff]  ;;  %v278_v8 = vld [vmem:[%s972_s1 + $0x1a8] sm:$0xff]  ;;  %v295_v9 = vld [vmem:[%s972_s1 + $0x230] sm:$0xff]  ;;  %s218_s17 = scalar_lea.vmem %s971_s0, %s621_s27  ;;  %s614_s27 = sshll.u32 %s979_s19, 3 }
   0xe   : > { %v293_v7 = vld [vmem:[%s972_s1 + $0x220] sm:$0xff]  ;;  %354 = vmatpush.msra.mxu1 %v297_v3  ;;  %362 = vmatpush.msra.mxu2 %v282_v4  ;;  %v274_v12 = vld [vmem:[%s972_s1 + $0x188] sm:$0xff]  ;;  %v287_v13 = vld [vmem:[%s972_s1 + $0x1f0] sm:$0xff]  ;;  %s222_s8 = scalar_lea.vmem %s976_s5, %s614_s27 }
   0xf   : > { %v281_v10 = vld [vmem:[%s972_s1 + $0x1c0] sm:$0xff]  ;;  %434 = vmatpush.msra.mxu3 %v299_v5  ;;  %321 = vmatpush.msra.mxu0 %v285_v6  ;;  %v291_v14 = vld [vmem:[%s972_s1 + $0x210] sm:$0xff]  ;;  %v270_v16 = vld [vmem:[%s972_s1 + $0x168] sm:$0xff] }
  0x10   : > { %v289_v11 = vld [vmem:[%s972_s1 + $0x200] sm:$0xff]  ;;  %355 = vmatpush.msra.mxu1 %v293_v7  ;;  %363 = vmatpush.msra.mxu2 %v278_v8  ;;  %v288_v17 = vld [vmem:[%s972_s1 + $0x1f8] sm:$0xff]  ;;  %v283_v18 = vld [vmem:[%s972_s1 + $0x1d0] sm:$0xff] }
  0x11   : > { %435 = vmatpush.msra.mxu3 %v295_v9  ;;  %322 = vmatpush.msra.mxu0 %v281_v10  ;;  %v277_v15 = vld [vmem:[%s972_s1 + $0x1a0] sm:$0xff]  ;;  %v266_v20 = vld [vmem:[%s972_s1 + $0x148] sm:$0xff]  ;;  %v284_v21 = vld [vmem:[%s972_s1 + $0x1d8] sm:$0xff] }
  0x12   : > { %356 = vmatpush.msra.mxu1 %v289_v11  ;;  %364 = vmatpush.msra.mxu2 %v274_v12  ;;  %v273_v19 = vld [vmem:[%s972_s1 + $0x180] sm:$0xff]  ;;  %v279_v22 = vld [vmem:[%s972_s1 + $0x1b0] sm:$0xff]  ;;  %v262_v24 = vld [vmem:[%s972_s1 + $0x128] sm:$0xff] }
  0x13   : > { %436 = vmatpush.msra.mxu3 %v291_v14  ;;  %323 = vmatpush.msra.mxu0 %v277_v15  ;;  %v269_v23 = vld [vmem:[%s972_s1 + $0x160] sm:$0xff]  ;;  %v280_v25 = vld [vmem:[%s972_s1 + $0x1b8] sm:$0xff]  ;;  %v275_v26 = vld [vmem:[%s972_s1 + $0x190] sm:$0xff] }
  0x14   : > { %401 = vmatpush.msrb.mxu1 %v287_v13  ;;  %365 = vmatpush.msra.mxu2 %v270_v16  ;;  %v265_v27 = vld [vmem:[%s972_s1 + $0x140] sm:$0xff]  ;;  %v258_v28 = vld [vmem:[%s972_s1 + $0x108] sm:$0xff]  ;;  %v276_v29 = vld [vmem:[%s972_s1 + $0x198] sm:$0xff] }
  0x15   : > { %441 = vmatpush.msrb.mxu3 %v288_v17  ;;  %324 = vmatpush.msra.mxu0 %v273_v19  ;;  %v271_v30 = vld [vmem:[%s972_s1 + $0x170] sm:$0xff]  ;;  %v261_v31 = vld [vmem:[%s972_s1 + $0x120] sm:$0xff]  ;;  %v254_v32 = vld [vmem:[%s972_s1 + $0xe8] sm:$0xff] }
  0x16   : > { %402 = vmatpush.msrb.mxu1 %v283_v18  ;;  %366 = vmatpush.msra.mxu2 %v266_v20  ;;  %v272_v33 = vld [vmem:[%s972_s1 + $0x178] sm:$0xff]  ;;  %v267_v34 = vld [vmem:[%s972_s1 + $0x150] sm:$0xff]  ;;  %v257_v35 = vld [vmem:[%s972_s1 + $0x100] sm:$0xff] }
  0x17   : > { %442 = vmatpush.msrb.mxu3 %v284_v21  ;;  %325 = vmatpush.msra.mxu0 %v269_v23  ;;  %v250_v36 = vld [vmem:[%s972_s1 + $0xc8] sm:$0xff]  ;;  %v268_v37 = vld [vmem:[%s972_s1 + $0x158] sm:$0xff]  ;;  %v263_v38 = vld [vmem:[%s972_s1 + $0x130] sm:$0xff] }
  0x18   : > { %403 = vmatpush.msrb.mxu1 %v279_v22  ;;  %367 = vmatpush.msra.mxu2 %v262_v24  ;;  %v253_v39 = vld [vmem:[%s972_s1 + $0xe0] sm:$0xff]  ;;  %v246_v40 = vld [vmem:[%s972_s1 + $0xa8] sm:$0xff]  ;;  %v264_v41 = vld [vmem:[%s972_s1 + $0x138] sm:$0xff] }
  0x19   : > { %443 = vmatpush.msrb.mxu3 %v280_v25  ;;  %326 = vmatpush.msra.mxu0 %v265_v27  ;;  %v259_v42 = vld [vmem:[%s972_s1 + $0x110] sm:$0xff]  ;;  %v249_v43 = vld [vmem:[%s972_s1 + $0xc0] sm:$0xff]  ;;  %v242_v44 = vld [vmem:[%s972_s1 + $0x88] sm:$0xff] }
  0x1a   : > { %404 = vmatpush.msrb.mxu1 %v275_v26  ;;  %368 = vmatpush.msra.mxu2 %v258_v28  ;;  %v260_v45 = vld [vmem:[%s972_s1 + $0x118] sm:$0xff]  ;;  %v255_v46 = vld [vmem:[%s972_s1 + $0xf0] sm:$0xff]  ;;  %v245_v47 = vld [vmem:[%s972_s1 + $0xa0] sm:$0xff] }
  0x1b   : > { %444 = vmatpush.msrb.mxu3 %v276_v29  ;;  %327 = vmatpush.msra.mxu0 %v261_v31  ;;  %v238_v48 = vld [vmem:[%s972_s1 + $0x68] sm:$0xff]  ;;  %v256_v49 = vld [vmem:[%s972_s1 + $0xf8] sm:$0xff]  ;;  %v251_v50 = vld [vmem:[%s972_s1 + $0xd0] sm:$0xff] }
  0x1c   : > { %405 = vmatpush.msrb.mxu1 %v271_v30  ;;  %369 = vmatpush.msra.mxu2 %v254_v32  ;;  %v241_v51 = vld [vmem:[%s972_s1 + $0x80] sm:$0xff]  ;;  %v234_v52 = vld [vmem:[%s972_s1 + $0x48] sm:$0xff]  ;;  %v252_v53 = vld [vmem:[%s972_s1 + $0xd8] sm:$0xff] }
  0x1d   : > { %445 = vmatpush.msrb.mxu3 %v272_v33  ;;  %328 = vmatpush.msra.mxu0 %v257_v35  ;;  %v247_v54 = vld [vmem:[%s972_s1 + $0xb0] sm:$0xff]  ;;  %v237_v55 = vld [vmem:[%s972_s1 + $0x60] sm:$0xff]  ;;  %v230_v56 = vld [vmem:[%s972_s1 + $0x28] sm:$0xff] }
  0x1e   : > { %406 = vmatpush.msrb.mxu1 %v267_v34  ;;  %370 = vmatpush.msra.mxu2 %v250_v36  ;;  %v248_v57 = vld [vmem:[%s972_s1 + $0xb8] sm:$0xff]  ;;  %v243_v58 = vld [vmem:[%s972_s1 + $0x90] sm:$0xff]  ;;  %v233_v59 = vld [vmem:[%s972_s1 + $0x40] sm:$0xff] }
  0x1f   : > { %446 = vmatpush.msrb.mxu3 %v268_v37  ;;  %329 = vmatpush.msra.mxu0 %v253_v39  ;;  %v224_v60 = vld [vmem:[%s218_s17 + $0x8] sm:$0xff]  ;;  %v244_v62 = vld [vmem:[%s972_s1 + $0x98] sm:$0xff]  ;;  %v888_v63 = vld [vmem:[%s218_s17] sm:$0xff] }
  0x20   : > { %407 = vmatpush.msrb.mxu1 %v263_v38  ;;  %371 = vmatpush.msra.mxu2 %v246_v40  ;;  %v226_v61 = vld [vmem:[%s972_s1 + $0x8] sm:$0xff]  ;;  %v239_v0 = vld [vmem:[%s972_s1 + $0x70] sm:$0xff]  ;;  %v229_v2 = vld [vmem:[%s972_s1 + $0x20] sm:$0xff] }
  0x21   : > { %447 = vmatpush.msrb.mxu3 %v264_v41  ;;  %330 = vmatpush.msra.mxu0 %v249_v43  ;;  %v302_v1 = vld [vmem:[%s972_s1 + $0x268] sm:$0xff]  ;;  %v240_v3 = vld [vmem:[%s972_s1 + $0x78] sm:$0xff]  ;;  %v235_v5 = vld [vmem:[%s972_s1 + $0x50] sm:$0xff] }
  0x22   : > { %408 = vmatpush.msrb.mxu1 %v259_v42  ;;  %372 = vmatpush.msra.mxu2 %v242_v44  ;;  %v298_v4 = vld [vmem:[%s972_s1 + $0x248] sm:$0xff]  ;;  %v225_v6 = vld [vmem:[%s972_s1] sm:$0xff]  ;;  %v236_v7 = vld [vmem:[%s972_s1 + $0x58] sm:$0xff] }
  0x23   : > { %448 = vmatpush.msrb.mxu3 %v260_v45  ;;  %331 = vmatpush.msra.mxu0 %v245_v47  ;;  %v294_v8 = vld [vmem:[%s972_s1 + $0x228] sm:$0xff]  ;;  %v231_v9 = vld [vmem:[%s972_s1 + $0x30] sm:$0xff]  ;;  %v232_v10 = vld [vmem:[%s972_s1 + $0x38] sm:$0xff]  ;;  %v486_v45 = vmul.f32 %v888_v63, %v888_v63 }
  0x24   : > { %409 = vmatpush.msrb.mxu1 %v255_v46  ;;  %373 = vmatpush.msra.mxu2 %v238_v48  ;;  %v290_v11 = vld [vmem:[%s972_s1 + $0x208] sm:$0xff]  ;;  %v304_v12 = vld [vmem:[%s972_s1 + $0x278] sm:$0xff]  ;;  %v227_v13 = vld [vmem:[%s972_s1 + $0x10] sm:$0xff] }
  0x25   : > { %449 = vmatpush.msrb.mxu3 %v256_v49  ;;  %332 = vmatpush.msra.mxu0 %v241_v51  ;;  %v228_v14 = vld [vmem:[%s972_s1 + $0x18] sm:$0xff]  ;;  %v305_v19 = vld [vmem:[%s973_s2] sm:$0xf] }
  0x26   : > { %410 = vmatpush.msrb.mxu1 %v251_v50  ;;  %374 = vmatpush.msra.mxu2 %v234_v52  ;;  %v300_v15 = vld [vmem:[%s972_s1 + $0x258] sm:$0xff]  ;;  %v309_v20 = vperm.slane %v305_v19, 0  ;;  %v311_v25 = vperm.slane %v305_v19, 2  ;;  %v310_v26 = vperm.slane %v305_v19, 1  ;;  %v312_v30 = vperm.slane %v305_v19, 3 }
  0x27   : > { %450 = vmatpush.msrb.mxu3 %v252_v53  ;;  %333 = vmatpush.msra.mxu0 %v237_v55  ;;  %v296_v16 = vld [vmem:[%s972_s1 + $0x238] sm:$0xff] }
  0x28   : > { %411 = vmatpush.msrb.mxu1 %v247_v54  ;;  %375 = vmatpush.msra.mxu2 %v230_v56  ;;  %v292_v17 = vld [vmem:[%s972_s1 + $0x218] sm:$0xff] }
  0x29   : > { %451 = vmatpush.msrb.mxu3 %v248_v57  ;;  %334 = vmatpush.msra.mxu0 %v233_v59 }
  0x2a   : > { %412 = vmatpush.msrb.mxu1 %v243_v58  ;;  %376 = vmatpush.msra.mxu2 %v226_v61 }
  0x2b   : > { %615 = vmatmul.msk.f32.vlgmr.msra.gmra.mxu1 %vm317_vm0, %v224_v60  ;;  %452 = vmatpush.msrb.mxu3 %v244_v62 }
  0x2c   : > { %377 = vmatmul.f32.vlgmr.msra.gmra.mxu2 %v888_v63  ;;  %413 = vmatpush.msrb.mxu1 %v239_v0 }
  0x2d   : > { %393 = vmatpush.msrb.mxu2 %v302_v1  ;;  %617 = vmatmul.msk.f32.vlgmr.msra.gmra.mxu3 %vm317_vm0, %v224_v60 }
  0x2e   : > { %335 = vmatpush.msra.mxu0 %v229_v2  ;;  %453 = vmatpush.msrb.mxu3 %v240_v3 }
  0x2f   : > { %394 = vmatpush.msrb.mxu2 %v298_v4  ;;  %414 = vmatpush.msrb.mxu1 %v235_v5 }
  0x30   : > { %336 = vmatpush.msra.mxu0 %v225_v6  ;;  %454 = vmatpush.msrb.mxu3 %v236_v7 }
  0x31   : > { %337 = vmatmul.f32.vlgmr.msra.gmra.mxu0 %v888_v63  ;;  %395 = vmatpush.msrb.mxu2 %v294_v8 }
  0x32   : > { %415 = vmatpush.msrb.mxu1 %v231_v9  ;;  %455 = vmatpush.msrb.mxu3 %v232_v10 }
  0x33   : > { %396 = vmatpush.msrb.mxu2 %v290_v11  ;;  %473 = vmatpush.msrb.mxu0 %v304_v12 }
  0x34   : > { %416 = vmatpush.msrb.mxu1 %v227_v13  ;;  %456 = vmatpush.msrb.mxu3 %v228_v14 }
  0x35   : > { %417 = vmatmul.f32.vlgmr.msrb.gmra.mxu1 %v888_v63  ;;  %616 = vmatmul.msk.f32.vlgmr.msrb.gmra.mxu2 %vm317_vm0, %v224_v60 }
  0x36   : > { %457 = vmatmul.f32.vlgmr.msrb.gmra.mxu3 %v888_v63  ;;  %474 = vmatpush.msrb.mxu0 %v300_v15 }
  0x38   : > { %475 = vmatpush.msrb.mxu0 %v296_v16 }
  0x3a   : > { %476 = vmatpush.msrb.mxu0 %v292_v17 }
  0x3b   : > { %618 = vmatmul.msk.f32.vlgmr.msrb.gmra.mxu0 %vm317_vm0, %v224_v60 }
  0xa8   : > { %v358_v18 = vpop.f32.mrf.mxu1 }
  0xae   : > { %v338_v21 = vpop.f32.mrf.mxu0 }
  0xaf   : > { %v378_v22 = vpop.f32.mrf.mxu2  ;;  %v339_v24 = vadd.f32 %v338_v21, %v309_v20 }
  0xb0   : > { %v438_v23 = vpop.f32.mrf.mxu3  ;;  %v379_v31 = vadd.f32 %v378_v22, %v310_v26  ;;  %v630_v26 = vld [vmem:[%s974_s3] ss:$0 sm:$0xff] }
  0xb1   : > { %v359_v28 = vadd.f32 %v358_v18, %v339_v24 }
  0xb2   : > { %v418_v27 = vpop.f32.mrf.mxu1 }
  0xb3   : > { %v419_v29 = vadd.f32 %v418_v27, %v311_v25  ;;  %v481_v36 = vmax.f32 %v359_v28, 0.0  ;;  %v631_v28 = vld [vmem:[%s975_s4] ss:$0 sm:$0xff] }
  0xb5   : > { %v439_v37 = vadd.f32 %v438_v23, %v419_v29 }
  0xb7   : > { %v483_v42 = vmul.f32 %v481_v36, %v439_v37 }
  0xb8   : > { %v398_v32 = vpop.f32.mrf.mxu2  ;;  %v478_v35 = vpop.f32.mrf.mxu0 }
  0xb9   : > { %v399_v33 = vadd.f32 %v398_v32, %v379_v31  ;;  %v458_v34 = vpop.f32.mrf.mxu3 }
  0xba   : > { %v459_v38 = vadd.f32 %v458_v34, %v312_v30 }
  0xbb   : > { %v482_v39 = vmax.f32 %v399_v33, 0.0 }
  0xbc   : > { %v479_v40 = vadd.f32 %v478_v35, %v459_v38 }
  0xbe   : > { %v484_v41 = vmul.f32 %v482_v39, %v479_v40 }
  0xc0   : > { %v485_v43 = vadd.f32 %v484_v41, %v483_v42 }
  0xc2   : > { %v501_v44 = vmul.f32 %v485_v43, %v485_v43 }
  0xc4   : > { %502 = vadd.xlane.f32.xlu0 %v501_v44 }
  0xcc   : > { %487 = vadd.xlane.f32.xlu0 %v486_v45 }
 0x137   : > { %v503_v46 = vpop.xlane.xlu0 %502 }
 0x138   : > { %632 = vrsqrt.f32 %v503_v46  ;;  %vm511_vm1 = vcmp.eq.f32.partialorder %v503_v46, inf  ;;  %v514_v58 = vand.u32 2147483648, %v503_v46  ;;  %vm513_vm2 = vcmp.eq.f32.partialorder %v503_v46, 0.0 }
 0x13e   : > { %v633_v47 = vpop.eup %632 }
 0x13f   : > { %v505_v48 = vmul.f32 %v633_v47, %v503_v46  ;;  %v488_v49 = vpop.xlane.xlu0 %487 }
 0x140   : > { %634 = vrsqrt.f32 %v488_v49  ;;  %vm496_vm3 = vcmp.eq.f32.partialorder %v488_v49, inf  ;;  %v499_v3 = vand.u32 2147483648, %v488_v49  ;;  %vm498_vm4 = vcmp.eq.f32.partialorder %v488_v49, 0.0 }
 0x141   : > { %v506_v50 = vmul.f32 %v633_v47, %v505_v48 }
 0x143   : > { %v507_v51 = vmul.f32 0.5, %v506_v50 }
 0x145   : > { %v508_v52 = vsub.f32 1.5, %v507_v51 }
 0x146   : > { %v635_v53 = vpop.eup %634 }
 0x147   : > { %v509_v54 = vmul.f32 %v633_v47, %v508_v52  ;;  %v490_v55 = vmul.f32 %v635_v53, %v488_v49 }
 0x149   : > { %v510_v56 = vmul.f32 %v509_v54, %v503_v46  ;;  %v491_v57 = vmul.f32 %v635_v53, %v490_v55 }
 0x14b   : > { %v512_v59 = vsel %vm511_vm1, %v503_v46, %v510_v56  ;;  %v492_v60 = vmul.f32 0.5, %v491_v57 }
 0x14c   : > { %v515_v61 = vsel %vm513_vm2, %v514_v58, %v512_v59 }
 0x14d   : > { %v493_v62 = vsub.f32 1.5, %v492_v60  ;;  %v516_v0 = vadd.f32 1e-06, %v515_v61 }
 0x14f   : > { %v494_v1 = vmul.f32 %v635_v53, %v493_v62  ;;  %636 = vrcp.f32 %v516_v0 }
 0x151   : > { %v495_v2 = vmul.f32 %v494_v1, %v488_v49 }
 0x153   : > { %v497_v4 = vsel %vm496_vm3, %v488_v49, %v495_v2 }
 0x154   : > { %v500_v5 = vsel %vm498_vm4, %v499_v3, %v497_v4 }
 0x155   : > { %v637_v6 = vpop.eup %636 }
 0x156   : > { %v518_v7 = vmul.f32 %v637_v6, %v500_v5 }
 0x158   : > { %v519_v8 = vmin.f32 %v518_v7, 1.0 }
 0x15a   : > { %v520_v9 = vmul.f32 %v519_v8, %v485_v43 }
 0x15c   : > { %v521_v10 = vadd.f32 %v520_v9, %v888_v63 }
 0x15e   : > { %522 = vadd.xlane.f32.xlu1 %v521_v10 }
 0x1d1   : > { %v523_v11 = vpop.xlane.xlu1 %522 }
 0x1d2   : > { %v524_v12 = vmul.f32 0.03125, %v523_v11 }
 0x1d4   : > { %v525_v13 = vsub.f32 %v521_v10, %v524_v12  ;;  %v529_v15 = vmul.f32 96.0, %v524_v12 }
 0x1d6   : > { %v526_v14 = vmul.f32 %v525_v13, %v525_v13  ;;  %v530_v16 = vmul.f32 %v529_v15, %v524_v12 }
 0x1d8   : > { %527 = vadd.xlane.f32.xlu1 %v526_v14 }
 0x24b   : > { %v528_v17 = vpop.xlane.xlu1 %527 }
 0x24c   : > { %v531_v18 = vsub.f32 %v528_v17, %v530_v16 }
 0x24e   : > { %v532_v19 = vmul.f32 0.03125, %v531_v18 }
 0x250   : > { %v533_v20 = vadd.f32 1e-12, %v532_v19 }
 0x252   : > { %638 = vrsqrt.f32 %v533_v20  ;;  %vm540_vm6 = vweird.f32 %v533_v20 }
 0x258   : > { %v639_v21 = vpop.eup %638 }
 0x259   : > { %v535_v22 = vmul.f32 %v639_v21, %v533_v20  ;;  %vm541_vm5 = vweird.f32 %v639_v21 }
 0x25a   : > { %vm542_vm7 = vmor %vm540_vm6, %vm541_vm5 }
 0x25b   : > { %v536_v23 = vmul.f32 %v639_v21, %v535_v22 }
 0x25d   : > { %v537_v24 = vmul.f32 0.5, %v536_v23 }
 0x25f   : > { %v538_v25 = vsub.f32 1.5, %v537_v24 }
 0x261   : > { %v539_v63 = vmul.f32 %v639_v21, %v538_v25 }
 0x263   : > { %v543_v27 = vsel %vm542_vm7, %v639_v21, %v539_v63 }
 0x264   : > { %v544_v29 = vmul.f32 %v543_v27, %v525_v13 }
 0x266   : > { %v548_v30 = vmul.f32 %v630_v26, %v544_v29 }
 0x268   : > { %v552_v31 = vadd.f32 %v631_v28, %v548_v30 }
 0x26a   : > { %553 = vst [vmem:[%s222_s8] sm:$0xff] %v552_v31 }
 0x26b PF: > { %s15_s18 = sadd.s32 1, %s646_s18  }
 0x26c   : > { %p12_p4 = scmp.ge.s32.totalorder %s15_s18, 4  }
 0x26e   :  { %14 = sbr.rel (!%p12_p4) target bundleno = 1 (0x1), region = 70 }

</bundles_post_ra>
